<compile_context>
chip_gen: v7x
topology: tpu7x:2x2x1
jax: 0.10.0
libtpu: 0.0.40
codegen_flags: <defaults>
</compile_context>

<pallas_src>
import jax
import jax.numpy as jnp
from jax import lax
from jax.experimental import pallas as pl
from jax.experimental.pallas import tpu as pltpu

_BN_EPS = 1e-5
# Live double-buffered tile budget (bytes). Conservative on every generation:
# v5e scoped-VMEM default 16 MiB, v6e/v7x 32 MiB, v7x physical 64 MiB / TC.
_VMEM_TILE_BUDGET = 8 * 1024 * 1024


def _convert_kernel(w_ref, b_ref, x_ref, o_ref):
    """o = relu(W_eff @ x + b_eff) on one lane-dense (Cout, tp) tile."""
    y = jnp.dot(w_ref[...], x_ref[...], preferred_element_type=jnp.float32)
    o_ref[...] = jnp.maximum(y + b_ref[...], 0.0).astype(o_ref.dtype)  # b: (Cout,1) bcasts


def _pick_lane_tile(cin, cout, hw, n_batch):
    """Lane tile (multiple of 128, or == hw for a single full-extent block),
    sized from the VMEM byte budget instead of a fixed cap."""
    # per lane column: double-buffered bf16 input tile + double-buffered f32 output tile
    per_lane = 2 * (cin * 2 + cout * 4)
    tp = max(128, (_VMEM_TILE_BUDGET // per_lane) // 128 * 128)
    if hw <= tp:
        tp = hw                        # one full-extent block along HW (no padding needed)
    # give v7x's second TensorCore work when the batch axis alone can't provide >=2 steps
    if n_batch * pl.cdiv(hw, tp) < 2 and hw >= 256:
        tp = pl.cdiv(pl.cdiv(hw, 2), 128) * 128
    return tp


@jax.jit
def _convert_scale(x_nchw, w_oihw, gamma, beta, mean, var):
    """Conv1x1 (no bias) -> BatchNorm (eval) -> ReLU for one pyramid level."""
    N, Cin, H, W = x_nchw.shape
    Cout = w_oihw.shape[0]
    HW = H * W

    # ---- fold eval-mode BatchNorm (running stats) into the conv weight/bias, in f32 ----
    scale = gamma / jnp.sqrt(var + _BN_EPS)                                   # (Cout,)
    w_eff = (w_oihw.reshape(Cout, Cin).astype(jnp.float32) * scale[:, None]
             ).astype(jnp.bfloat16)                                           # bf16 MXU feed
    b_eff = (beta - mean * scale).reshape(Cout, 1).astype(jnp.float32)

    # ---- free contiguous reshape: NCHW -> (N, Cin, H*W); bf16 halves HBM input bytes ----
    # TODO(synk): in a full model the upstream layer would already emit bf16, so this cast
    # fuses away; on this standalone f32 test input it is one extra elementwise pass.
    x = x_nchw.reshape(N, Cin, HW).astype(jnp.bfloat16)

    tp = _pick_lane_tile(Cin, Cout, HW, N)
    n_hw = pl.cdiv(HW, tp)

    vmem_needed = 2 * tp * (Cin * 2 + Cout * 4) + 2 * (Cout * Cin * 2 + Cout * 4)
    vmem_limit = int(min(32 << 20, max(2 * vmem_needed, 16 << 20)))

    out = pl.pallas_call(
        _convert_kernel,
        out_shape=jax.ShapeDtypeStruct((N, Cout, HW), jnp.float32),
        grid_spec=pltpu.PrefetchScalarGridSpec(
            num_scalar_prefetch=0,
            grid=(N, n_hw),
            in_specs=[
                pl.BlockSpec((Cout, Cin), lambda n, j: (0, 0)),       # fused conv+BN weight
                pl.BlockSpec((Cout, 1), lambda n, j: (0, 0)),         # fused BN bias
                pl.BlockSpec((pl.Squeezed(), Cin, tp), lambda n, j: (n, 0, j)),
            ],
            out_specs=pl.BlockSpec((pl.Squeezed(), Cout, tp), lambda n, j: (n, 0, j)),
        ),
        compiler_params=pltpu.CompilerParams(
            dimension_semantics=("parallel", "parallel"),
            vmem_limit_bytes=vmem_limit),
    )(w_eff, b_eff, x)

    # ---- free contiguous reshape back to NCHW ----
    return out.reshape(N, Cout, H, W)


def convert_layer_forward(list_x, params):
    """ConvertLayer.forward: apply conv1x1 -> BN -> ReLU to each input in the list."""
    # TODO(synk): BatchNorm uses eval-mode running statistics folded into the conv;
    # training-mode batch statistics are not computed inside the kernel.
    # TODO(synk): all pyramid levels could be fused into one pallas_call via
    # scalar-prefetched per-level offsets; kept one call per level because channel
    # counts and spatial shapes differ between levels.
    return [_convert_scale(x, *p) for x, p in zip(list_x, params)]


def init_params(key, list_k):
    """Deterministic init: Conv2d default uniform +-1/sqrt(fan_in); random BN stats."""
    params = []
    for cin, cout in zip(list_k[0], list_k[1]):
        key, kw, kg, kb, km, kv = jax.random.split(key, 6)
        bound = 1.0 / jnp.sqrt(float(cin))                        # fan_in = cin*1*1
        w = jax.random.uniform(kw, (cout, cin, 1, 1), jnp.float32, -bound, bound)
        gamma = jax.random.uniform(kg, (cout,), jnp.float32, 0.5, 1.5)
        beta = jax.random.uniform(kb, (cout,), jnp.float32, -0.5, 0.5)
        mean = 0.1 * jax.random.normal(km, (cout,), jnp.float32)
        var = jax.random.uniform(kv, (cout,), jnp.float32, 0.5, 1.5)
        params.append((w, gamma, beta, mean, var))
    return params


def reference_forward(list_x, params):
    """Pure-JAX f32 reference (lax.conv + eval-mode BN + ReLU) in NCHW."""
    outs = []
    for x, (w, gamma, beta, mean, var) in zip(list_x, params):
        y = lax.conv_general_dilated(
            x.astype(jnp.float32), w, (1, 1), "VALID",
            dimension_numbers=("NCHW", "OIHW", "NCHW"))
        scale = gamma / jnp.sqrt(var + _BN_EPS)
        y = y * scale.reshape(1, -1, 1, 1) + (beta - mean * scale).reshape(1, -1, 1, 1)
        outs.append(jnp.maximum(y, 0.0))
    return outs


if __name__ == "__main__":
    key = jax.random.PRNGKey(0)
    k0, k1, kp = jax.random.split(key, 3)

    # two pyramid levels: channels 4 -> 8 at 16x16, channels 8 -> 4 at 8x8
    list_k = [[4, 8], [8, 4]]
    x0 = jax.random.normal(k0, (2, 4, 16, 16), jnp.float32)
    x1 = jax.random.normal(k1, (2, 8, 8, 8), jnp.float32)
    params = init_params(kp, list_k)

    outs = convert_layer_forward([x0, x1], params)
    outs = jax.block_until_ready(outs)

    refs = jax.block_until_ready(reference_forward([x0, x1], params))
    assert outs[0].shape == (2, 8, 16, 16)
    assert outs[1].shape == (2, 4, 8, 8)
    # tolerance reflects the bf16 activation/weight feed (MXU accumulates in f32)
    for o, r in zip(outs, refs):
        assert jnp.allclose(o, r, rtol=2e-2, atol=2e-2), "mismatch vs reference"

    print("KERNEL_OK")
</pallas_src>

<mosaic_0001>
module attributes {stable_mosaic.version = 11 : i64} {
  func.func @_convert_kernel(%arg0: i32, %arg1: i32, %arg2: memref<8x4xbf16, #tpu.memory_space<vmem>>, %arg3: memref<8x1xf32, #tpu.memory_space<vmem>>, %arg4: memref<1x4x256xbf16, #tpu.memory_space<vmem>>, %arg5: memref<1x8x256xf32, #tpu.memory_space<vmem>>) attributes {dimension_semantics = [#tpu.dimension_semantics<parallel>, #tpu.dimension_semantics<parallel>], iteration_bounds = array<i64: 2, 1>, scalar_prefetch = 0 : i64, scratch_operands = 0 : i64, tpu.core_type = #tpu.core_type<tc>, window_params = [{pipeline_mode = #tpu.pipeline_mode<synchronous>, transform_indices = @transform_0, window_bounds = array<i64: 8, 4>}, {pipeline_mode = #tpu.pipeline_mode<synchronous>, transform_indices = @transform_1, window_bounds = array<i64: 8, 1>}, {transform_indices = @transform_2, window_bounds = array<i64: 1, 4, 256>}, {transform_indices = @transform_3, window_bounds = array<i64: 1, 8, 256>}]} {
    %c0 = arith.constant 0 : index
    %c0_0 = arith.constant 0 : index
    %0 = vector.load %arg2[%c0, %c0_0] : memref<8x4xbf16, #tpu.memory_space<vmem>>, vector<8x4xbf16>
    %c0_1 = arith.constant 0 : index
    %c0_2 = arith.constant 0 : index
    %c0_3 = arith.constant 0 : index
    %1 = vector.load %arg4[%c0_1, %c0_2, %c0_3] : memref<1x4x256xbf16, #tpu.memory_space<vmem>>, vector<1x4x256xbf16>
    %2 = vector.shape_cast %1 : vector<1x4x256xbf16> to vector<4x256xbf16>
    %cst = arith.constant dense<0.000000e+00> : vector<8x256xf32>
    %3 = tpu.matmul %0, %2, %cst {dimension_numbers = #tpu.dot_dimension_numbers<[1], [0], [0], [1], [0, 0, 1, 1], [], []>} : vector<8x4xbf16>, vector<4x256xbf16>, vector<8x256xf32> -> vector<8x256xf32>
    %c0_4 = arith.constant 0 : index
    %c0_5 = arith.constant 0 : index
    %4 = vector.load %arg3[%c0_4, %c0_5] : memref<8x1xf32, #tpu.memory_space<vmem>>, vector<8x1xf32>
    %5 = vector.broadcast %4 : vector<8x1xf32> to vector<8x256xf32>
    %6 = arith.addf %3, %5 : vector<8x256xf32>
    %cst_6 = arith.constant 0.000000e+00 : f32
    %7 = vector.broadcast %cst_6 : f32 to vector<8x256xf32>
    %8 = arith.maximumf %6, %7 : vector<8x256xf32>
    %c0_7 = arith.constant 0 : index
    %c0_8 = arith.constant 0 : index
    %c0_9 = arith.constant 0 : index
    %9 = vector.load %arg5[%c0_7, %c0_8, %c0_9] : memref<1x8x256xf32, #tpu.memory_space<vmem>>, vector<1x8x256xf32>
    %10 = vector.shape_cast %9 : vector<1x8x256xf32> to vector<8x256xf32>
    %11 = vector.shape_cast %8 : vector<8x256xf32> to vector<1x8x256xf32>
    tpu.vector_store %arg5[%c0_7, %c0_8, %c0_9], %11 {strides = array<i32>} : memref<1x8x256xf32, #tpu.memory_space<vmem>>, vector<1x8x256xf32>,
    return
  }
  func.func @transform_0(%arg0: i32, %arg1: i32) -> (i32, i32) {
    %c0_i32 = arith.constant 0 : i32
    %c0_i32_0 = arith.constant 0 : i32
    %c0_i32_1 = arith.constant 0 : i32
    return %c0_i32, %c0_i32_0 : i32, i32
  }
  func.func @transform_1(%arg0: i32, %arg1: i32) -> (i32, i32) {
    %c0_i32 = arith.constant 0 : i32
    %c0_i32_0 = arith.constant 0 : i32
    %c0_i32_1 = arith.constant 0 : i32
    return %c0_i32, %c0_i32_0 : i32, i32
  }
  func.func @transform_2(%arg0: i32, %arg1: i32) -> (i32, i32, i32) {
    %c0_i32 = arith.constant 0 : i32
    %c0_i32_0 = arith.constant 0 : i32
    return %arg0, %c0_i32, %arg1 : i32, i32, i32
  }
  func.func @transform_3(%arg0: i32, %arg1: i32) -> (i32, i32, i32) {
    %c0_i32 = arith.constant 0 : i32
    %c0_i32_0 = arith.constant 0 : i32
    return %arg0, %c0_i32, %arg1 : i32, i32, i32
  }
}

</mosaic_0001>

<bundles_post_ra>
// kernel: _convert_scale.1
= control target key start
LH: loop header
LB: loop body
LE: loop exit
PB: predicated region body
PF: predicated region fallthrough
CT: control target
= control target key end

     0   :  { %s458_s12 = smov 0   ;;  %s460_s13 = smov 0   ;;  %s497_s0 = inlined_call_operand.vmem [shape: bf16[8,4], index: 0, kind: input, shape index: {}]   ;;  %s498_s1 = inlined_call_operand.vmem [shape: f32[8,1], index: 1, kind: input, shape index: {}]   ;;  %s499_s2 = inlined_call_operand.vmem [shape: bf16[2,4,256], index: 2, kind: input, shape index: {}]   ;;  %s500_s3 = inlined_call_operand.vmem [shape: f32[2,8,256], index: 3, kind: output, shape index: {}]  }
   0x1   :  { %s462_s14 = smov 0  }
   0x2 LB: > { %s25_s15 = sadd.s32 1, %s431_s13  ;;  %p375_p0 = scmp.ge.s32.totalorder %s435_s14, 1  ;;  %s435_s14 = sphi %s462_s14, %s13_s14   ;;  %s431_s13 = sphi %s460_s13, %s502_s13   ;;  %s427_s12 = sphi %s458_s12, %s501_s12  }
   0x3   : > { %p27_p1 = scmp.ge.s32.totalorder %s25_s15, 2  ;;  %p158_p2 = scmp.lt.s32.totalorder %s435_s14, 3 }
   0x5   : > { %s504_s15 = smov (%p27_p1, %s25_s15), 0  ;;  %p159_p3 = pnand %p375_p0, %p158_p2 }
   0x6   : > { %p191_p4 = scmp.lt.s32.totalorder (!%p159_p3), %s427_s12, 1  ;;  %v437_v0 = vmov (!%p159_p3), 0   ;;  %v213_v1 = vld [vmem:[%s498_s1] sm:$0xff] (!%p159_p3)  ;;  %vm232_vm0 = vcmask (!%p159_p3), 1041408   ;;  %vm228_vm1 = vcmask (!%p159_p3), 31744  }
   0x7   : > { %162 = sbr.rel (%p159_p3) target bundleno = 242 (0xf2), region = 32  ;;  %271 = vmatprep.mubr.bf16.mxu0 (!%p159_p3), %v437_v0  ;;  %412 = vset.pattern.permute.xlu0 (!%p159_p3), %v437_v0  ;;  %v211_v5 = vld [vmem:[%s497_s0] sm:$0xf] (!%p159_p3) }
   0x8   : > { %216 = vperm.xlu0 (!%p159_p3), %412, %v213_v1  }
   0xe   : > { %s506_s12 = smov (!%p191_p4, %s427_s12), 1 }
   0xf   : > { %s385_s18 = sshll.u32 %s506_s12, 2  ;;  %s386_s24 = sshll.u32 %s506_s12, 4 }
  0x10   : > { %s198_s21 = scalar_lea.vmem %s499_s2, %s385_s18  ;;  %s208_s27 = scalar_lea.vmem %s500_s3, %s386_s24 }
  0x11   : > { %v380_v2 = vld.sshfl [vmem:[%s198_s21] sm:$0x33 pattern:$0x76325410] }
  0x12   : > { %v227_v3 = vcombine.high %v380_v2, %v380_v2  ;;  %v234_v4 = vsel %vm232_vm0, %v380_v2, 0 }
  0x14   : > { %381 = vmatprep.subr.msk.bf16.mxu0 %vm232_vm0, %v227_v3 }
  0x15   : > { %240 = vmatpush1.bf16.msra.mxu0 %v234_v4 }
  0x18   : > { %382 = vmatmul.mubr.msk.bf16.vlgmr.msra.gmra.mrb[0].mxu0 %vm228_vm1, %v211_v5 }
  0x87   : > { %v217_v6 = vpop.permute.xlu0 %216 }
  0xeb   : > { %v273_v7 = vpop.f32.mrb[0].mxu0 }
  0xec   : > { %v274_v8 = vadd.f32 %v273_v7, %v217_v6  ;;  %v275_v9 = vpop.f32.mrb[1].mxu0 }
  0xed   : > { %v276_v10 = vadd.f32 %v275_v9, %v217_v6  ;;  %v277_v11 = vpop.f32.mrb[2].mxu0 }
  0xee   : > { %v280_v12 = vmax.f32 %v274_v8, 0.0  ;;  %v278_v13 = vpop.f32.mrb[3].mxu0 }
  0xef   : > { %v281_v14 = vmax.f32 %v276_v10, 0.0 }
  0xf0   : > { %282 = vst [vmem:[%s208_s27] sm:$0xff] %v280_v12 }
  0xf1   : > { %283 = vst [vmem:[%s208_s27 + $0x8] sm:$0xff] %v281_v14 }
  0xf2 PF: > { %s13_s14 = sadd.s32 1, %s435_s14   ;;  %s501_s12 = smov %s431_s13 }
  0xf3   : > { %p10_p5 = scmp.ge.s32.totalorder %s13_s14, 4   ;;  %s502_s13 = smov %s504_s15 }
  0xf5   :  { %12 = sbr.rel (!%p10_p5) target bundleno = 2 (0x2), region = 62 }

</bundles_post_ra>
